<compile_context>
chip_gen: v6e
topology: v6e:2x2x1
jax: 0.10.0
libtpu: 0.0.40
codegen_flags: <defaults>
</compile_context>

<pallas_src>
import jax
import jax.numpy as jnp
from jax.experimental import pallas as pl
from jax.experimental.pallas import tpu as pltpu


def _round_up(x, m):
    return ((x + m - 1) // m) * m


def mlp_kernel(x_ref, w1_ref, b1_ref, w2_ref, b2_ref, w3_ref, b3_ref, o_ref):
    # Linear(input_dim, 256) + ReLU  -- bf16 MXU matmul, f32 accumulation / epilogue.
    h1 = jnp.dot(x_ref[...], w1_ref[...], preferred_element_type=jnp.float32)
    h1 = jnp.maximum(h1 + b1_ref[...], 0.0)
    # Linear(256, 128) + ReLU
    h2 = jnp.dot(h1.astype(w2_ref.dtype), w2_ref[...],
                 preferred_element_type=jnp.float32)
    h2 = jnp.maximum(h2 + b2_ref[...], 0.0)
    # Linear(128, output_dim_padded)  (lane-dense, padded to a multiple of 128)
    out = jnp.dot(h2.astype(w3_ref.dtype), w3_ref[...],
                  preferred_element_type=jnp.float32)
    o_ref[...] = (out + b3_ref[...]).astype(o_ref.dtype)


def mlp_forward(x, params, *, batch_tile=256, vmem_limit_bytes=32 * 1024 * 1024):
    w1, b1, w2, b2, w3, b3 = params
    B, D_in = x.shape
    D_out = w3.shape[1]
    out_dtype = x.dtype

    # ---- lane-dense output: zero-pad final layer columns up to a multiple of 128 ----
    D_out_pad = _round_up(D_out, 128)
    if D_out_pad != D_out:
        w3 = jnp.pad(w3, ((0, 0), (0, D_out_pad - D_out)))
        b3 = jnp.pad(b3, ((0, 0), (0, D_out_pad - D_out)))

    # ---- batch tiling: large tiles (>=256 when B allows) amortize grid overhead ----
    tile = _round_up(min(batch_tile, _round_up(B, 8)), 8)
    B_pad = _round_up(B, tile)
    if B_pad != B:
        x = jnp.pad(x, ((0, B_pad - B), (0, 0)))
    grid = (B_pad // tile,)

    # ---- bf16 MXU inputs; biases stay f32 for the VPU epilogue ----
    x_bf = x.astype(jnp.bfloat16)
    w1_bf = w1.astype(jnp.bfloat16)
    w2_bf = w2.astype(jnp.bfloat16)
    w3_bf = w3.astype(jnp.bfloat16)
    b1_f = b1.astype(jnp.float32)
    b2_f = b2.astype(jnp.float32)
    b3_f = b3.astype(jnp.float32)

    # Weights/biases: same full block every grid step -> stay resident in VMEM.
    def const_spec(shape):
        return pl.BlockSpec(shape, lambda i: (0,) * len(shape))

    out_pad = pl.pallas_call(
        mlp_kernel,
        out_shape=jax.ShapeDtypeStruct((B_pad, D_out_pad), out_dtype),
        grid_spec=pltpu.PrefetchScalarGridSpec(
            num_scalar_prefetch=0,
            grid=grid,
            in_specs=[
                pl.BlockSpec((tile, D_in), lambda i: (i, 0)),   # x tile
                const_spec(w1_bf.shape),
                const_spec(b1_f.shape),
                const_spec(w2_bf.shape),
                const_spec(b2_f.shape),
                const_spec(w3_bf.shape),
                const_spec(b3_f.shape),
            ],
            out_specs=pl.BlockSpec((tile, D_out_pad), lambda i: (i, 0)),
        ),
        compiler_params=pltpu.CompilerParams(
            dimension_semantics=("parallel",),   # batch axis shards across TCs (v7x)
            vmem_limit_bytes=vmem_limit_bytes,
        ),
    )(x_bf, w1_bf, b1_f, w2_bf, b2_f, w3_bf, b3_f)

    # Strip batch / output-lane padding.
    return out_pad[:B, :D_out]


def init_params(key, input_dim, output_dim, dtype=jnp.float32):
    """Deterministic init mirroring nn.Linear shapes (weights stored as [in, out])."""
    dims = [(input_dim, 256), (256, 128), (128, output_dim)]
    params = []
    for d_in, d_out in dims:
        kw, kb, key = jax.random.split(key, 3)
        bound = 1.0 / jnp.sqrt(d_in)
        w = jax.random.uniform(kw, (d_in, d_out), dtype, -bound, bound)
        b = jax.random.uniform(kb, (1, d_out), dtype, -bound, bound)
        params += [w, b]
    return tuple(params)


def mlp_reference(x, params):
    w1, b1, w2, b2, w3, b3 = params
    h1 = jnp.maximum(x @ w1 + b1, 0.0)
    h2 = jnp.maximum(h1 @ w2 + b2, 0.0)
    return h2 @ w3 + b3


if __name__ == "__main__":
    key = jax.random.PRNGKey(0)
    kx, kp = jax.random.split(key)

    batch, input_dim, output_dim = 8, 32, 16
    x = jax.random.normal(kx, (batch, input_dim), jnp.float32)
    params = init_params(kp, input_dim, output_dim)

    y = mlp_forward(x, params)
    y = jax.block_until_ready(y)

    y_ref = mlp_reference(x, params)
    assert y.shape == (batch, output_dim)
    # bf16 MXU inputs (f32 accumulation) -> loosened tolerance vs. the f32 reference.
    assert jnp.allclose(y, y_ref, atol=5e-2, rtol=5e-2)

    print("KERNEL_OK")
</pallas_src>

<mosaic_0001>
module attributes {stable_mosaic.version = 11 : i64} {
  func.func @mlp_kernel(%arg0: i32, %arg1: memref<8x32xbf16, #tpu.memory_space<vmem>>, %arg2: memref<32x256xbf16, #tpu.memory_space<vmem>>, %arg3: memref<1x256xf32, #tpu.memory_space<vmem>>, %arg4: memref<256x128xbf16, #tpu.memory_space<vmem>>, %arg5: memref<1x128xf32, #tpu.memory_space<vmem>>, %arg6: memref<128x128xbf16, #tpu.memory_space<vmem>>, %arg7: memref<1x128xf32, #tpu.memory_space<vmem>>, %arg8: memref<8x128xf32, #tpu.memory_space<vmem>>) attributes {dimension_semantics = [#tpu.dimension_semantics<parallel>], iteration_bounds = array<i64: 1>, scalar_prefetch = 0 : i64, scratch_operands = 0 : i64, tpu.core_type = #tpu.core_type<tc>, window_params = [{transform_indices = @transform_0, window_bounds = array<i64: 8, 32>}, {pipeline_mode = #tpu.pipeline_mode<synchronous>, transform_indices = @transform_1, window_bounds = array<i64: 32, 256>}, {pipeline_mode = #tpu.pipeline_mode<synchronous>, transform_indices = @transform_2, window_bounds = array<i64: 1, 256>}, {pipeline_mode = #tpu.pipeline_mode<synchronous>, transform_indices = @transform_3, window_bounds = array<i64: 256, 128>}, {pipeline_mode = #tpu.pipeline_mode<synchronous>, transform_indices = @transform_4, window_bounds = array<i64: 1, 128>}, {pipeline_mode = #tpu.pipeline_mode<synchronous>, transform_indices = @transform_5, window_bounds = array<i64: 128, 128>}, {pipeline_mode = #tpu.pipeline_mode<synchronous>, transform_indices = @transform_6, window_bounds = array<i64: 1, 128>}, {transform_indices = @transform_7, window_bounds = array<i64: 8, 128>}]} {
    %c0 = arith.constant 0 : index
    %c0_0 = arith.constant 0 : index
    %0 = vector.load %arg1[%c0, %c0_0] : memref<8x32xbf16, #tpu.memory_space<vmem>>, vector<8x32xbf16>
    %c0_1 = arith.constant 0 : index
    %c0_2 = arith.constant 0 : index
    %1 = vector.load %arg2[%c0_1, %c0_2] : memref<32x256xbf16, #tpu.memory_space<vmem>>, vector<32x256xbf16>
    %cst = arith.constant dense<0.000000e+00> : vector<8x256xf32>
    %2 = tpu.matmul %0, %1, %cst {dimension_numbers = #tpu.dot_dimension_numbers<[1], [0], [0], [1], [0, 0, 1, 1], [], []>} : vector<8x32xbf16>, vector<32x256xbf16>, vector<8x256xf32> -> vector<8x256xf32>
    %c0_3 = arith.constant 0 : index
    %c0_4 = arith.constant 0 : index
    %3 = vector.load %arg3[%c0_3, %c0_4] : memref<1x256xf32, #tpu.memory_space<vmem>>, vector<1x256xf32>
    %4 = vector.broadcast %3 : vector<1x256xf32> to vector<8x256xf32>
    %5 = arith.addf %2, %4 : vector<8x256xf32>
    %cst_5 = arith.constant 0.000000e+00 : f32
    %6 = vector.broadcast %cst_5 : f32 to vector<8x256xf32>
    %7 = arith.maximumf %5, %6 : vector<8x256xf32>
    %8 = arith.truncf %7 : vector<8x256xf32> to vector<8x256xbf16>
    %c0_6 = arith.constant 0 : index
    %c0_7 = arith.constant 0 : index
    %9 = vector.load %arg4[%c0_6, %c0_7] : memref<256x128xbf16, #tpu.memory_space<vmem>>, vector<256x128xbf16>
    %cst_8 = arith.constant dense<0.000000e+00> : vector<8x128xf32>
    %10 = tpu.matmul %8, %9, %cst_8 {dimension_numbers = #tpu.dot_dimension_numbers<[1], [0], [0], [1], [0, 0, 1, 1], [], []>} : vector<8x256xbf16>, vector<256x128xbf16>, vector<8x128xf32> -> vector<8x128xf32>
    %c0_9 = arith.constant 0 : index
    %c0_10 = arith.constant 0 : index
    %11 = vector.load %arg5[%c0_9, %c0_10] : memref<1x128xf32, #tpu.memory_space<vmem>>, vector<1x128xf32>
    %12 = vector.broadcast %11 : vector<1x128xf32> to vector<8x128xf32>
    %13 = arith.addf %10, %12 : vector<8x128xf32>
    %cst_11 = arith.constant 0.000000e+00 : f32
    %14 = vector.broadcast %cst_11 : f32 to vector<8x128xf32>
    %15 = arith.maximumf %13, %14 : vector<8x128xf32>
    %16 = arith.truncf %15 : vector<8x128xf32> to vector<8x128xbf16>
    %c0_12 = arith.constant 0 : index
    %c0_13 = arith.constant 0 : index
    %17 = vector.load %arg6[%c0_12, %c0_13] : memref<128x128xbf16, #tpu.memory_space<vmem>>, vector<128x128xbf16>
    %cst_14 = arith.constant dense<0.000000e+00> : vector<8x128xf32>
    %18 = tpu.matmul %16, %17, %cst_14 {dimension_numbers = #tpu.dot_dimension_numbers<[1], [0], [0], [1], [0, 0, 1, 1], [], []>} : vector<8x128xbf16>, vector<128x128xbf16>, vector<8x128xf32> -> vector<8x128xf32>
    %c0_15 = arith.constant 0 : index
    %c0_16 = arith.constant 0 : index
    %19 = vector.load %arg7[%c0_15, %c0_16] : memref<1x128xf32, #tpu.memory_space<vmem>>, vector<1x128xf32>
    %20 = vector.broadcast %19 : vector<1x128xf32> to vector<8x128xf32>
    %21 = arith.addf %18, %20 : vector<8x128xf32>
    %c0_17 = arith.constant 0 : index
    %c0_18 = arith.constant 0 : index
    %22 = vector.load %arg8[%c0_17, %c0_18] : memref<8x128xf32, #tpu.memory_space<vmem>>, vector<8x128xf32>
    tpu.vector_store %arg8[%c0_17, %c0_18], %21 {strides = array<i32>} : memref<8x128xf32, #tpu.memory_space<vmem>>, vector<8x128xf32>,
    return
  }
  func.func @transform_0(%arg0: i32) -> (i32, i32) {
    %c0_i32 = arith.constant 0 : i32
    %c0_i32_0 = arith.constant 0 : i32
    return %arg0, %c0_i32 : i32, i32
  }
  func.func @transform_1(%arg0: i32) -> (i32, i32) {
    %c0_i32 = arith.constant 0 : i32
    %c0_i32_0 = arith.constant 0 : i32
    %c0_i32_1 = arith.constant 0 : i32
    return %c0_i32, %c0_i32_0 : i32, i32
  }
  func.func @transform_2(%arg0: i32) -> (i32, i32) {
    %c0_i32 = arith.constant 0 : i32
    %c0_i32_0 = arith.constant 0 : i32
    %c0_i32_1 = arith.constant 0 : i32
    return %c0_i32, %c0_i32_0 : i32, i32
  }
  func.func @transform_3(%arg0: i32) -> (i32, i32) {
    %c0_i32 = arith.constant 0 : i32
    %c0_i32_0 = arith.constant 0 : i32
    %c0_i32_1 = arith.constant 0 : i32
    return %c0_i32, %c0_i32_0 : i32, i32
  }
  func.func @transform_4(%arg0: i32) -> (i32, i32) {
    %c0_i32 = arith.constant 0 : i32
    %c0_i32_0 = arith.constant 0 : i32
    %c0_i32_1 = arith.constant 0 : i32
    return %c0_i32, %c0_i32_0 : i32, i32
  }
  func.func @transform_5(%arg0: i32) -> (i32, i32) {
    %c0_i32 = arith.constant 0 : i32
    %c0_i32_0 = arith.constant 0 : i32
    %c0_i32_1 = arith.constant 0 : i32
    return %c0_i32, %c0_i32_0 : i32, i32
  }
  func.func @transform_6(%arg0: i32) -> (i32, i32) {
    %c0_i32 = arith.constant 0 : i32
    %c0_i32_0 = arith.constant 0 : i32
    %c0_i32_1 = arith.constant 0 : i32
    return %c0_i32, %c0_i32_0 : i32, i32
  }
  func.func @transform_7(%arg0: i32) -> (i32, i32) {
    %c0_i32 = arith.constant 0 : i32
    %c0_i32_0 = arith.constant 0 : i32
    return %arg0, %c0_i32 : i32, i32
  }
}

</mosaic_0001>

<bundles_post_ra>
// kernel: tpu_custom_call.1
= control target key start
LH: loop header
LB: loop body
LE: loop exit
PB: predicated region body
PF: predicated region fallthrough
CT: control target
= control target key end

     0   :  { %12 = vsyncpa [#allocation3], 0  ;;  %s781_s0 = inlined_call_operand.hbm [shape: bf16[8,32], index: 0, kind: input, shape index: {}]   ;;  %s782_s1 = inlined_call_operand.hbm [shape: bf16[32,256], index: 1, kind: input, shape index: {}]   ;;  %s783_s2 = inlined_call_operand.vmem [shape: f32[1,256], index: 2, kind: input, shape index: {}]   ;;  %s784_s3 = inlined_call_operand.hbm [shape: bf16[256,128], index: 3, kind: input, shape index: {}]   ;;  %s785_s4 = inlined_call_operand.vmem [shape: f32[1,128], index: 4, kind: input, shape index: {}]   ;;  %s786_s5 = inlined_call_operand.hbm [shape: bf16[128,128], index: 5, kind: input, shape index: {}]   ;;  %s787_s6 = inlined_call_operand.vmem [shape: f32[1,128], index: 6, kind: input, shape index: {}]   ;;  %s788_s7 = inlined_call_operand.hbm [shape: f32[8,128], index: 7, kind: output, shape index: {}]  }
   0x1   :  { %13 = vsyncpa [#allocation6], 0 }
   0x2   :  { %14 = vsyncpa [#allocation9], 0 }
   0x3   :  { %15 = vsyncpa [#allocation4], 0  ;;  %s705_s24 = smov [#allocation5]  }
   0x4   :  { %s31_s25 = sshll.u32 %s705_s24, 4  ;;  %s32_s25 = int_to_ptr.vmem [resolvable:$true] %s31_s25 }
   0x5   :  { %s605_s26 = scalar_lea.vmem %s32_s25, 512  ;;  %p610_p1 = scmp.lt.s32.totalorder %s32_s25, %s32_s25 }
   0x6   :  { %p606_p0 = scmp.ne.s32.totalorder %s32_s25, %s605_s26  ;;  %p611_p2 = scmp.lt.s32.totalorder %s605_s26, %s605_s26 }
   0x8   :  { %p612_p3 = por %p611_p2, %p610_p1 }
   0xa   :  { %p613_p4 = pnand %p612_p3, %p606_p0 }
   0xc   :  { %616 = shalt.err (!%p613_p4)
}
   0xd   :  { %s706_s27 = smov 128   ;;  %s707_s28 = smov 8  }
   0xe   :  { %37 = dma.hbm_to_vmem [thread:$0]  %s782_s1, 512, %s32_s25, [#allocation6], %s706_s27, %s706_s27, %s707_s28  }
   0xf   :  { %s708_s8 = smov [#allocation2]   ;;  %s709_s10 = smov [#allocation7]  }
  0x10   :  { %s22_s9 = sshll.u32 %s708_s8, 4  ;;  %s45_s11 = sshll.u32 %s709_s10, 4  ;;  %s23_s9 = int_to_ptr.vmem [resolvable:$true] %s22_s9  ;;  %s46_s11 = int_to_ptr.vmem [resolvable:$true] %s45_s11 }
  0x11   :  { %s625_s12 = scalar_lea.vmem %s23_s9, 64  ;;  %p630_p6 = scmp.lt.s32.totalorder %s23_s9, %s23_s9 }
  0x12   :  { %p626_p5 = scmp.ne.s32.totalorder %s23_s9, %s625_s12  ;;  %p631_p7 = scmp.lt.s32.totalorder %s625_s12, %s625_s12 }
  0x14   :  { %p632_p8 = por %p631_p7, %p630_p6 }
  0x16   :  { %p633_p9 = pnand %p632_p8, %p626_p5 }
  0x18   :  { %636 = shalt.err (!%p633_p9)
}
  0x19   :  { %25 = dma.hbm_to_vmem [thread:$0]  %s781_s0, 64, %s23_s9, [#allocation3]  }
  0x1a   :  { %s645_s15 = scalar_lea.vmem %s46_s11, 2048  ;;  %p650_p11 = scmp.lt.s32.totalorder %s46_s11, %s46_s11 }
  0x1b   :  { %p646_p10 = scmp.ne.s32.totalorder %s46_s11, %s645_s15  ;;  %p651_p12 = scmp.lt.s32.totalorder %s645_s15, %s645_s15 }
  0x1d   :  { %p652_p13 = por %p651_p12, %p650_p11 }
  0x1f   :  { %p653_p0 = pnand %p652_p13, %p646_p10 }
  0x21   :  { %656 = shalt.err (!%p653_p0)
}
  0x22   :  { %s710_s1 = smov 64   ;;  %s711_s16 = smov 4  }
  0x23   :  { %51 = dma.hbm_to_vmem [thread:$0]  %s784_s3, 2048, %s46_s11, [#allocation6], %s710_s1, %s710_s1, %s711_s16  }
  0x24   :  { %s712_s19 = smov [#allocation8]  }
  0x25   :  { %s59_s20 = sshll.u32 %s712_s19, 4  ;;  %s60_s20 = int_to_ptr.vmem [resolvable:$true] %s59_s20 }
  0x26   :  { %s665_s21 = scalar_lea.vmem %s60_s20, 1024  ;;  %p670_p2 = scmp.lt.s32.totalorder %s60_s20, %s60_s20 }
  0x27   :  { %p666_p1 = scmp.ne.s32.totalorder %s60_s20, %s665_s21  ;;  %p671_p3 = scmp.lt.s32.totalorder %s665_s21, %s665_s21 }
  0x29   :  { %p672_p4 = por %p671_p3, %p670_p2 }
  0x2b   :  { %p673_p5 = pnand %p672_p4, %p666_p1 }
  0x2d   :  { %676 = shalt.err (!%p673_p5)
}
  0x2e   :  { %65 = dma.hbm_to_vmem [thread:$0]  %s786_s5, 1024, %s60_s20, [#allocation9], %s710_s1, %s710_s1, %s711_s16  }
  0x2f   :  { %697 = dma.done.wait [#allocation3], 64  }
  0x30   :  { %698 = vsyncadd [#allocation3], 4294967232 }
  0x31   :  { %699 = dma.done.wait [#allocation6], 2560  }
  0x32   :  { %700 = vsyncadd [#allocation6], 4294964736 }
  0x33   :  { %701 = dma.done.wait [#allocation9], 1024  }
  0x34   :  { %702 = vsyncadd [#allocation9], 4294966272  ;;  %v713_v0 = vmov 0   ;;  %v567_v1 = vld [vmem:[#allocation5 + $0x14] ss:$8 sps:$4 sm:$0xff]   ;;  %vm118_vm0 = vcmask 261120   ;;  %v88_v28 = vlaneseq }
  0x35   :  { %154 = vmatprep.mubr.bf16.mxu0 %v713_v0  ;;  %v569_v2 = vld [vmem:[#allocation5 + $0x10] ss:$8 sps:$4 sm:$0xff]   ;;  %134 = vmatprep.subr.bf16.mxu0 %v567_v1  ;;  %v570_v3 = vld [vmem:[#allocation5 + $0x4] ss:$8 sps:$4 sm:$0xff]   ;;  %v572_v4 = vld [vmem:[#allocation5] ss:$8 sps:$4 sm:$0xff]  }
  0x36   :  { %135 = vmatpush1.bf16.msra.mxu0 %v569_v2  ;;  %v573_v5 = vld [vmem:[#allocation7 + $0x78] sm:$0xff]   ;;  %v575_v8 = vld [vmem:[#allocation7 + $0x70] sm:$0xff]   ;;  %v577_v10 = vld [vmem:[#allocation7 + $0x68] sm:$0xff]   ;;  %v714_v23 = vmov 0.0   ;;  %v89_v29 = vshrl.u32 %v88_v28, 7  ;;  %vm715_vm1 = vmmov 0  }
  0x37   :  { %136 = vmatprep.subr.bf16.mxu0 %v570_v3  ;;  %v574_v6 = vld [vmem:[#allocation7 + $0x38] sm:$0xff]   ;;  %504 = vmatprep.subr.bf16.mxu1 %v573_v5  ;;  %v576_v9 = vld [vmem:[#allocation7 + $0x30] sm:$0xff]   ;;  %v578_v11 = vld [vmem:[#allocation7 + $0x28] sm:$0xff]   ;;  %s716_s26 = smov [#allocation10]  }
  0x38   :  { %v81_v7 = vld [vmem:[#allocation2] sm:$0xf]  ;;  %505 = vmatpush3.bf16.msra.mxu1 %v574_v6  ;;  %v579_v12 = vld [vmem:[#allocation7 + $0x60] sm:$0xff]   ;;  %v583_v16 = vld [vmem:[#allocation7 + $0x50] sm:$0xff]   ;;  %v90_v30 = vsub.s32 0, %v89_v29  ;;  %v94_v32 = vsub.s32 1, %v89_v29 }
  0x39   :  { %506 = vmatprep.subr.bf16.mxu1 %v575_v8  ;;  %v580_v13 = vld [vmem:[#allocation7 + $0x20] sm:$0xff]   ;;  %v581_v14 = vld [vmem:[#allocation7 + $0x58] sm:$0xff]   ;;  %v584_v17 = vld [vmem:[#allocation7 + $0x10] sm:$0xff]   ;;  %s462_s27 = sshll.u32 %s716_s26, 4  ;;  %s463_s27 = int_to_ptr.vmem [resolvable:$true] %s462_s27 }
  0x3a   :  { %137 = vmatpush1.bf16.msra.mxu0 %v572_v4  ;;  %v582_v15 = vld [vmem:[#allocation7 + $0x18] sm:$0xff]   ;;  %v585_v18 = vld [vmem:[#allocation7 + $0x48] sm:$0xff]   ;;  %v587_v20 = vld [vmem:[#allocation7 + $0x40] sm:$0xff]   ;;  %p682_p7 = scmp.lt.s32.totalorder %s463_s27, %s463_s27 }
  0x3b   :  { %v586_v19 = vld [vmem:[#allocation7 + $0x8] sm:$0xff]   ;;  %v588_v21 = vld [vmem:[#allocation7] sm:$0xff]   ;;  %v589_v22 = vld [vmem:[#allocation8 + $0x38] sm:$0xff]   ;;  %535 = vmatprep.subr.bf16.mxu0 %v714_v23 }
  0x3c   :  { %507 = vmatpush3.bf16.msra.mxu1 %v576_v9  ;;  %v590_v24 = vld [vmem:[#allocation8 + $0x30] sm:$0xff]   ;;  %v591_v25 = vld [vmem:[#allocation8 + $0x28] sm:$0xff]   ;;  %v592_v26 = vld [vmem:[#allocation8 + $0x20] sm:$0xff]  }
  0x3d   :  { %477 = vmatmul.mubr.msk.bf16.vlgmr.msra.gmra.mxu0 %vm118_vm0, %v81_v7  ;;  %508 = vmatprep.subr.bf16.mxu1 %v577_v10  ;;  %v593_v27 = vld [vmem:[#allocation8 + $0x18] sm:$0xff]   ;;  %v594_v45 = vld [vmem:[#allocation8 + $0x10] sm:$0xff]   ;;  %v595_v46 = vld [vmem:[#allocation8 + $0x8] sm:$0xff]  }
  0x3e   :  { %536 = vmatpush3.bf16.msra.mxu0 %v589_v22  ;;  %v86_v31 = vld [vmem:[%s783_s2] sm:$0x3]  ;;  %v596_v47 = vld [vmem:[#allocation8] sm:$0xff]   ;;  %551 = vmatprep.mubr.msk.bf16.mxu0 %vm715_vm1, %v714_v23 }
  0x3f   :  { %537 = vmatprep.subr.bf16.mxu0 %v714_v23  ;;  %v91_v33 = vrot.slane %v86_v31, %v90_v30  ;;  %v95_v34 = vrot.slane %v86_v31, %v94_v32  ;;  %v478_v49 = vld [vmem:[%s785_s4] ss:$0 sm:$0xff]  ;;  %s677_s4 = scalar_lea.vmem %s463_s27, 128 }
  0x40   :  { %509 = vmatpush3.bf16.msra.mxu1 %v578_v11  ;;  %v495_v57 = vld [vmem:[%s787_s6] ss:$0 sm:$0xff]  ;;  %p678_p6 = scmp.ne.s32.totalorder %s463_s27, %s677_s4  ;;  %p683_p8 = scmp.lt.s32.totalorder %s677_s4, %s677_s4 }
  0x41   :  { %510 = vmatprep.subr.bf16.mxu1 %v579_v12 }
  0x42   :  { %538 = vmatpush3.bf16.msra.mxu0 %v590_v24  ;;  %p684_p9 = por %p683_p8, %p682_p7 }
  0x43   :  { %539 = vmatprep.subr.bf16.mxu0 %v714_v23 }
  0x44   :  { %511 = vmatpush3.bf16.msra.mxu1 %v580_v13  ;;  %p685_p10 = pnand %p684_p9, %p678_p6 }
  0x45   :  { %512 = vmatprep.subr.bf16.mxu1 %v581_v14 }
  0x46   :  { %540 = vmatpush3.bf16.msra.mxu0 %v591_v25 }
  0x47   :  { %541 = vmatprep.subr.bf16.mxu0 %v714_v23 }
  0x48   :  { %513 = vmatpush3.bf16.msra.mxu1 %v582_v15 }
  0x49   :  { %514 = vmatprep.subr.bf16.mxu1 %v583_v16 }
  0x4a   :  { %542 = vmatpush3.bf16.msra.mxu0 %v592_v26 }
  0x4b   :  { %543 = vmatprep.subr.bf16.mxu0 %v714_v23 }
  0x4c   :  { %515 = vmatpush3.bf16.msra.mxu1 %v584_v17 }
  0x4d   :  { %516 = vmatprep.subr.bf16.mxu1 %v585_v18 }
  0x4e   :  { %544 = vmatpush3.bf16.msra.mxu0 %v593_v27 }
  0x4f   :  { %545 = vmatprep.subr.bf16.mxu0 %v714_v23 }
  0x50   :  { %517 = vmatpush3.bf16.msra.mxu1 %v586_v19 }
  0x51   :  { %518 = vmatprep.subr.bf16.mxu1 %v587_v20 }
  0x52   :  { %546 = vmatpush3.bf16.msra.mxu0 %v594_v45 }
  0x53   :  { %547 = vmatprep.subr.bf16.mxu0 %v714_v23 }
  0x54   :  { %519 = vmatpush3.bf16.msra.mxu1 %v588_v21 }
  0x56   :  { %548 = vmatpush3.bf16.msra.mxu0 %v595_v46 }
  0x57   :  { %549 = vmatprep.subr.bf16.mxu0 %v714_v23 }
  0x5a   :  { %550 = vmatpush3.bf16.msra.mxu0 %v596_v47 }
  0xfd   :  { %v156_v35 = vpop.f32.mrf.mxu0 }
  0xfe   :  { %v157_v36 = vadd.f32 %v156_v35, %v91_v33 }
  0xff   :  { %v158_v37 = vpop.f32.mrf.mxu0 }
 0x100   :  { %v159_v38 = vadd.f32 %v158_v37, %v95_v34  ;;  %v163_v39 = vmax.f32 %v157_v36, 0.0 }
 0x101   :  { %v160_v40 = vpop.f32.mrf.mxu0 }
 0x102   :  { %v164_v41 = vmax.f32 %v159_v38, 0.0  ;;  %v165_v44 = vpack.c.bf16 %v163_v39, %v163_v39 }
 0x103   :  { %v161_v42 = vpop.f32.mrf.mxu0 }
 0x104   :  { %v166_v43 = vpack.c.bf16 %v164_v41, %v164_v41 }
 0x106   :  { %334 = vmatprep.mubr.bf16.mxu1 %v166_v43 }
 0x107   :  { %335 = vmatmul.mubr.bf16.vlgmr.msra.gmra.mxu1 %v165_v44 }
 0x1c7   :  { %v520_v48 = vpop.f32.mrf.mxu1 }
 0x1c9   :  { %v521_v50 = vpop.f32.mrf.mxu1 }
 0x1ca   :  { %v522_v51 = vadd.f32 %v521_v50, %v520_v48 }
 0x1cb   :  { %v523_v52 = vpop.f32.mrf.mxu1 }
 0x1cc   :  { %v337_v53 = vadd.f32 %v522_v51, %v478_v49 }
 0x1cd   :  { %v524_v54 = vpop.f32.mrf.mxu1 }
 0x1ce   :  { %v342_v55 = vmax.f32 %v337_v53, 0.0 }
 0x1d0   :  { %v343_v56 = vpack.c.bf16 %v342_v55, %v342_v55 }
 0x1d2   :  { %552 = vmatmul.mubr.bf16.vlgmr.msra.gmra.mxu0 %v343_v56 }
 0x292   :  { %v449_v58 = vpop.f32.mrf.mxu0 }
 0x293   :  { %v450_v59 = vadd.f32 %v495_v57, %v449_v58 }
 0x294   :  { %v553_v60 = vpop.f32.mrf.mxu0 }
 0x295   :  { %455 = vst [vmem:[#allocation10] sm:$0xff] %v450_v59 }
 0x296   :  { %v452_v61 = vpop.f32.mrf.mxu0 }
 0x297   :  { %688 = shalt.err (!%p685_p10)
}
 0x298   :  { %465 = dma.vmem_to_hbm [thread:$0]  %s463_s27, 128, %s788_s7, [#allocation4]   ;;  %v554_v62 = vpop.f32.mrf.mxu0 }
 0x299   :  { %703 = dma.done.wait [#allocation4], 128  }
 0x29a   :  { %704 = vsyncadd [#allocation4], 4294967168 }
 0x29b   :  { %469 = vsyncpa [#allocation3], 1 }
 0x29c   :  { %470 = vsyncpa [#allocation6], 1 }
 0x29d   :  { %471 = vsyncpa [#allocation9], 1 }
 0x29e   :  { %472 = vsyncpa [#allocation4], 1 }

</bundles_post_ra>
